<compile_context>
chip_gen: v7x
topology: tpu7x:2x2x1
jax: 0.10.0
libtpu: 0.0.40
codegen_flags: <defaults>
</compile_context>

<pallas_src>
import jax
import jax.numpy as jnp
from jax import lax
from jax.experimental import pallas as pl
from jax.experimental.pallas import tpu as pltpu  # noqa: F401

BETA_THRESH = 0.1   # beta in cos_batch_torch threshold
BETA_IPOT = 0.5     # beta in IPOT_torch_batch_uniform
IPOT_ITERS = 5      # GW_distance_node passes iteration=5 into IPOT
NORM_EPS = 1e-12


def _mvm_kernel(imgs_ref, caps_ref, scores_ref, ot_ref):
    x = imgs_ref[...].astype(jnp.float32)   # (N, D)
    y = caps_ref[...].astype(jnp.float32)   # (M, D)
    N, D = x.shape
    M = y.shape[0]

    # ---- scores = imgs @ caps.T : one MXU matmul, contracting D vs D (no .T) ----
    scores = lax.dot_general(
        x, y, (((1,), (1,)), ((), ())), preferred_element_type=jnp.float32
    )  # (N, M)
    scores_ref[...] = scores.astype(scores_ref.dtype)

    # ---- cosine-distance cost matrix, derived from the existing `scores` ----
    # cos_sim(x_i, y_j) = scores[i, j] / ((||x_i|| + eps) * (||y_j|| + eps))
    inv_xnorm = 1.0 / (jnp.sqrt(jnp.sum(x * x, axis=1, keepdims=True)) + NORM_EPS)  # (N,1)
    # y squared row-norms laid out along lanes directly: ones(1,D) . (y*y)^T
    ynorm_sq_row = lax.dot_general(
        jnp.ones((1, D), jnp.float32), y * y, (((1,), (1,)), ((), ())),
        preferred_element_type=jnp.float32,
    )  # (1, M)
    inv_ynorm_row = 1.0 / (jnp.sqrt(ynorm_sq_row) + NORM_EPS)                        # (1,M)
    cos_dis = 1.0 - scores * inv_xnorm * inv_ynorm_row                               # (N,M)

    min_s = jnp.min(cos_dis)
    max_s = jnp.max(cos_dis)
    threshold = min_s + BETA_THRESH * (max_s - min_s)
    Cs = jnp.maximum(cos_dis - threshold, 0.0)   # relu, shape (N, M)

    # ---- IPOT with uniform marginals (transpose-free formulation) ----
    A = jnp.exp(Cs * (-1.0 / BETA_IPOT))                         # exp(-Cs/beta), (N,M)
    sigma_row = jnp.full((1, M), 1.0 / float(M), jnp.float32)    # sigma^T
    T = jnp.ones((N, M), jnp.float32)
    for _ in range(IPOT_ITERS):                                  # static 5-iter unroll
        Q = A * T                                                # (N, M)
        qs = jnp.sum(Q * sigma_row, axis=1, keepdims=True)       # (N,1)  == Q @ sigma
        delta = 1.0 / (float(N) * qs)                            # (N,1)
        a_row = jnp.sum(Q * delta, axis=0, keepdims=True)        # (1,M)  == (Q^T delta)^T
        sigma_row = 1.0 / (float(M) * a_row)                     # (1,M)
        T = delta * Q * sigma_row

    # ---- scores_ot = trace(Cs^T @ T) == elementwise sum(Cs * T) ----
    distance = jnp.sum(Cs * T)
    ot_ref[...] = distance.reshape(1, 1)


def multi_view_matching(imgs, caps):
    """imgs: (N, D) f32, caps: (M, D) f32 -> (scores (N, M), scores_ot scalar)."""
    N, D = imgs.shape
    M, D2 = caps.shape
    assert D == D2
    scores, ot = pl.pallas_call(
        _mvm_kernel,
        out_shape=(
            jax.ShapeDtypeStruct((N, M), jnp.float32),
            jax.ShapeDtypeStruct((1, 1), jnp.float32),
        ),
        # Problem is small: full-array blocks, everything resident in VMEM.
        in_specs=[
            pl.BlockSpec((N, D), lambda: (0, 0)),
            pl.BlockSpec((M, D), lambda: (0, 0)),
        ],
        out_specs=(
            pl.BlockSpec((N, M), lambda: (0, 0)),
            pl.BlockSpec((1, 1), lambda: (0, 0)),
        ),
    )(imgs, caps)
    return scores, ot.reshape(())


if __name__ == "__main__":
    key = jax.random.PRNGKey(0)
    k1, k2 = jax.random.split(key)
    num_imgs, num_caps, hidden = 16, 8, 32
    imgs = jax.random.normal(k1, (num_imgs, hidden), jnp.float32)
    caps = jax.random.normal(k2, (num_caps, hidden), jnp.float32)

    scores, scores_ot = multi_view_matching(imgs, caps)
    jax.block_until_ready((scores, scores_ot))

    assert scores.shape == (num_imgs, num_caps)
    assert scores_ot.shape == ()
    assert bool(jnp.all(jnp.isfinite(scores)))
    assert bool(jnp.isfinite(scores_ot))
    print("KERNEL_OK")
</pallas_src>

<mosaic_0001>
module attributes {stable_mosaic.version = 11 : i64} {
  func.func @_mvm_kernel(%arg0: memref<16x32xf32, #tpu.memory_space<vmem>>, %arg1: memref<8x32xf32, #tpu.memory_space<vmem>>, %arg2: memref<16x8xf32, #tpu.memory_space<vmem>>, %arg3: memref<1x1xf32, #tpu.memory_space<vmem>>) attributes {dimension_semantics = [], scalar_prefetch = 0 : i64, scratch_operands = 0 : i64, tpu.core_type = #tpu.core_type<tc>} {
    %c0 = arith.constant 0 : index
    %c0_0 = arith.constant 0 : index
    %0 = vector.load %arg0[%c0, %c0_0] : memref<16x32xf32, #tpu.memory_space<vmem>>, vector<16x32xf32>
    %c0_1 = arith.constant 0 : index
    %c0_2 = arith.constant 0 : index
    %1 = vector.load %arg1[%c0_1, %c0_2] : memref<8x32xf32, #tpu.memory_space<vmem>>, vector<8x32xf32>
    %cst = arith.constant dense<0.000000e+00> : vector<16x8xf32>
    %2 = tpu.matmul %0, %1, %cst {dimension_numbers = #tpu.dot_dimension_numbers<[1], [1], [0], [0], [0, 0, 1, 0], [], []>} : vector<16x32xf32>, vector<8x32xf32>, vector<16x8xf32> -> vector<16x8xf32>
    %c0_3 = arith.constant 0 : index
    %c0_4 = arith.constant 0 : index
    %3 = vector.load %arg2[%c0_3, %c0_4] : memref<16x8xf32, #tpu.memory_space<vmem>>, vector<16x8xf32>
    tpu.vector_store %arg2[%c0_3, %c0_4], %2 {strides = array<i32>} : memref<16x8xf32, #tpu.memory_space<vmem>>, vector<16x8xf32>,
    %4 = arith.mulf %0, %0 : vector<16x32xf32>
    %cst_5 = arith.constant dense<0.000000e+00> : vector<16xf32>
    %5 = vector.multi_reduction <add>, %4, %cst_5 [1] : vector<16x32xf32> to vector<16xf32>
    %6 = vector.shape_cast %5 : vector<16xf32> to vector<16x1xf32>
    %7 = math.sqrt %6 : vector<16x1xf32>
    %cst_6 = arith.constant 9.99999996E-13 : f32
    %8 = vector.broadcast %cst_6 : f32 to vector<16x1xf32>
    %9 = arith.addf %7, %8 : vector<16x1xf32>
    %cst_7 = arith.constant 1.000000e+00 : f32
    %10 = vector.broadcast %cst_7 : f32 to vector<16x1xf32>
    %11 = arith.divf %10, %9 : vector<16x1xf32>
    %cst_8 = arith.constant 1.000000e+00 : f32
    %12 = vector.broadcast %cst_8 : f32 to vector<1x32xf32>
    %13 = arith.mulf %1, %1 : vector<8x32xf32>
    %cst_9 = arith.constant dense<0.000000e+00> : vector<1x8xf32>
    %14 = tpu.matmul %12, %13, %cst_9 {dimension_numbers = #tpu.dot_dimension_numbers<[1], [1], [0], [0], [0, 0, 1, 0], [], []>} : vector<1x32xf32>, vector<8x32xf32>, vector<1x8xf32> -> vector<1x8xf32>
    %15 = math.sqrt %14 : vector<1x8xf32>
    %cst_10 = arith.constant 9.99999996E-13 : f32
    %16 = vector.broadcast %cst_10 : f32 to vector<1x8xf32>
    %17 = arith.addf %15, %16 : vector<1x8xf32>
    %cst_11 = arith.constant 1.000000e+00 : f32
    %18 = vector.broadcast %cst_11 : f32 to vector<1x8xf32>
    %19 = arith.divf %18, %17 : vector<1x8xf32>
    %20 = vector.broadcast %11 : vector<16x1xf32> to vector<16x8xf32>
    %21 = arith.mulf %2, %20 : vector<16x8xf32>
    %22 = vector.broadcast %19 : vector<1x8xf32> to vector<16x8xf32>
    %23 = arith.mulf %21, %22 : vector<16x8xf32>
    %cst_12 = arith.constant 1.000000e+00 : f32
    %24 = vector.broadcast %cst_12 : f32 to vector<16x8xf32>
    %25 = arith.subf %24, %23 : vector<16x8xf32>
    %26 = vector.shape_cast %25 : vector<16x8xf32> to vector<1x16x8xf32>
    %cst_13 = arith.constant dense<0x7F800000> : vector<1xf32>
    %27 = vector.multi_reduction <minimumf>, %26, %cst_13 [1, 2] : vector<1x16x8xf32> to vector<1xf32>
    %28 = vector.shape_cast %27 : vector<1xf32> to vector<1x1x1xf32>
    %29 = vector.extract %28[0, 0, 0] : f32 from vector<1x1x1xf32>
    %30 = vector.shape_cast %25 : vector<16x8xf32> to vector<1x16x8xf32>
    %cst_14 = arith.constant dense<0xFF800000> : vector<1xf32>
    %31 = vector.multi_reduction <maximumf>, %30, %cst_14 [1, 2] : vector<1x16x8xf32> to vector<1xf32>
    %32 = vector.shape_cast %31 : vector<1xf32> to vector<1x1x1xf32>
    %33 = vector.extract %32[0, 0, 0] : f32 from vector<1x1x1xf32>
    %34 = arith.subf %33, %29 : f32
    %cst_15 = arith.constant 1.000000e-01 : f32
    %35 = arith.mulf %cst_15, %34 : f32
    %36 = arith.addf %29, %35 : f32
    %37 = vector.broadcast %36 : f32 to vector<16x8xf32>
    %38 = arith.subf %25, %37 : vector<16x8xf32>
    %cst_16 = arith.constant 0.000000e+00 : f32
    %39 = vector.broadcast %cst_16 : f32 to vector<16x8xf32>
    %40 = arith.maximumf %38, %39 : vector<16x8xf32>
    %cst_17 = arith.constant -2.000000e+00 : f32
    %41 = vector.broadcast %cst_17 : f32 to vector<16x8xf32>
    %42 = arith.mulf %40, %41 : vector<16x8xf32>
    %43 = math.exp %42 : vector<16x8xf32>
    %cst_18 = arith.constant 1.250000e-01 : f32
    %44 = vector.broadcast %cst_18 : f32 to vector<1x8xf32>
    %cst_19 = arith.constant 1.000000e+00 : f32
    %45 = vector.broadcast %cst_19 : f32 to vector<16x8xf32>
    %46 = arith.mulf %43, %45 : vector<16x8xf32>
    %47 = vector.broadcast %44 : vector<1x8xf32> to vector<16x8xf32>
    %48 = arith.mulf %46, %47 : vector<16x8xf32>
    %cst_20 = arith.constant dense<0.000000e+00> : vector<16xf32>
    %49 = vector.multi_reduction <add>, %48, %cst_20 [1] : vector<16x8xf32> to vector<16xf32>
    %50 = vector.shape_cast %49 : vector<16xf32> to vector<16x1xf32>
    %cst_21 = arith.constant 1.600000e+01 : f32
    %51 = vector.broadcast %cst_21 : f32 to vector<16x1xf32>
    %52 = arith.mulf %51, %50 : vector<16x1xf32>
    %cst_22 = arith.constant 1.000000e+00 : f32
    %53 = vector.broadcast %cst_22 : f32 to vector<16x1xf32>
    %54 = arith.divf %53, %52 : vector<16x1xf32>
    %55 = vector.broadcast %54 : vector<16x1xf32> to vector<16x8xf32>
    %56 = arith.mulf %46, %55 : vector<16x8xf32>
    %cst_23 = arith.constant dense<0.000000e+00> : vector<8xf32>
    %57 = vector.multi_reduction <add>, %56, %cst_23 [0] : vector<16x8xf32> to vector<8xf32>
    %58 = vector.shape_cast %57 : vector<8xf32> to vector<1x8xf32>
    %cst_24 = arith.constant 8.000000e+00 : f32
    %59 = vector.broadcast %cst_24 : f32 to vector<1x8xf32>
    %60 = arith.mulf %59, %58 : vector<1x8xf32>
    %cst_25 = arith.constant 1.000000e+00 : f32
    %61 = vector.broadcast %cst_25 : f32 to vector<1x8xf32>
    %62 = arith.divf %61, %60 : vector<1x8xf32>
    %63 = vector.broadcast %54 : vector<16x1xf32> to vector<16x8xf32>
    %64 = arith.mulf %63, %46 : vector<16x8xf32>
    %65 = vector.broadcast %62 : vector<1x8xf32> to vector<16x8xf32>
    %66 = arith.mulf %64, %65 : vector<16x8xf32>
    %67 = arith.mulf %43, %66 : vector<16x8xf32>
    %68 = vector.broadcast %62 : vector<1x8xf32> to vector<16x8xf32>
    %69 = arith.mulf %67, %68 : vector<16x8xf32>
    %cst_26 = arith.constant dense<0.000000e+00> : vector<16xf32>
    %70 = vector.multi_reduction <add>, %69, %cst_26 [1] : vector<16x8xf32> to vector<16xf32>
    %71 = vector.shape_cast %70 : vector<16xf32> to vector<16x1xf32>
    %cst_27 = arith.constant 1.600000e+01 : f32
    %72 = vector.broadcast %cst_27 : f32 to vector<16x1xf32>
    %73 = arith.mulf %72, %71 : vector<16x1xf32>
    %cst_28 = arith.constant 1.000000e+00 : f32
    %74 = vector.broadcast %cst_28 : f32 to vector<16x1xf32>
    %75 = arith.divf %74, %73 : vector<16x1xf32>
    %76 = vector.broadcast %75 : vector<16x1xf32> to vector<16x8xf32>
    %77 = arith.mulf %67, %76 : vector<16x8xf32>
    %cst_29 = arith.constant dense<0.000000e+00> : vector<8xf32>
    %78 = vector.multi_reduction <add>, %77, %cst_29 [0] : vector<16x8xf32> to vector<8xf32>
    %79 = vector.shape_cast %78 : vector<8xf32> to vector<1x8xf32>
    %cst_30 = arith.constant 8.000000e+00 : f32
    %80 = vector.broadcast %cst_30 : f32 to vector<1x8xf32>
    %81 = arith.mulf %80, %79 : vector<1x8xf32>
    %cst_31 = arith.constant 1.000000e+00 : f32
    %82 = vector.broadcast %cst_31 : f32 to vector<1x8xf32>
    %83 = arith.divf %82, %81 : vector<1x8xf32>
    %84 = vector.broadcast %75 : vector<16x1xf32> to vector<16x8xf32>
    %85 = arith.mulf %84, %67 : vector<16x8xf32>
    %86 = vector.broadcast %83 : vector<1x8xf32> to vector<16x8xf32>
    %87 = arith.mulf %85, %86 : vector<16x8xf32>
    %88 = arith.mulf %43, %87 : vector<16x8xf32>
    %89 = vector.broadcast %83 : vector<1x8xf32> to vector<16x8xf32>
    %90 = arith.mulf %88, %89 : vector<16x8xf32>
    %cst_32 = arith.constant dense<0.000000e+00> : vector<16xf32>
    %91 = vector.multi_reduction <add>, %90, %cst_32 [1] : vector<16x8xf32> to vector<16xf32>
    %92 = vector.shape_cast %91 : vector<16xf32> to vector<16x1xf32>
    %cst_33 = arith.constant 1.600000e+01 : f32
    %93 = vector.broadcast %cst_33 : f32 to vector<16x1xf32>
    %94 = arith.mulf %93, %92 : vector<16x1xf32>
    %cst_34 = arith.constant 1.000000e+00 : f32
    %95 = vector.broadcast %cst_34 : f32 to vector<16x1xf32>
    %96 = arith.divf %95, %94 : vector<16x1xf32>
    %97 = vector.broadcast %96 : vector<16x1xf32> to vector<16x8xf32>
    %98 = arith.mulf %88, %97 : vector<16x8xf32>
    %cst_35 = arith.constant dense<0.000000e+00> : vector<8xf32>
    %99 = vector.multi_reduction <add>, %98, %cst_35 [0] : vector<16x8xf32> to vector<8xf32>
    %100 = vector.shape_cast %99 : vector<8xf32> to vector<1x8xf32>
    %cst_36 = arith.constant 8.000000e+00 : f32
    %101 = vector.broadcast %cst_36 : f32 to vector<1x8xf32>
    %102 = arith.mulf %101, %100 : vector<1x8xf32>
    %cst_37 = arith.constant 1.000000e+00 : f32
    %103 = vector.broadcast %cst_37 : f32 to vector<1x8xf32>
    %104 = arith.divf %103, %102 : vector<1x8xf32>
    %105 = vector.broadcast %96 : vector<16x1xf32> to vector<16x8xf32>
    %106 = arith.mulf %105, %88 : vector<16x8xf32>
    %107 = vector.broadcast %104 : vector<1x8xf32> to vector<16x8xf32>
    %108 = arith.mulf %106, %107 : vector<16x8xf32>
    %109 = arith.mulf %43, %108 : vector<16x8xf32>
    %110 = vector.broadcast %104 : vector<1x8xf32> to vector<16x8xf32>
    %111 = arith.mulf %109, %110 : vector<16x8xf32>
    %cst_38 = arith.constant dense<0.000000e+00> : vector<16xf32>
    %112 = vector.multi_reduction <add>, %111, %cst_38 [1] : vector<16x8xf32> to vector<16xf32>
    %113 = vector.shape_cast %112 : vector<16xf32> to vector<16x1xf32>
    %cst_39 = arith.constant 1.600000e+01 : f32
    %114 = vector.broadcast %cst_39 : f32 to vector<16x1xf32>
    %115 = arith.mulf %114, %113 : vector<16x1xf32>
    %cst_40 = arith.constant 1.000000e+00 : f32
    %116 = vector.broadcast %cst_40 : f32 to vector<16x1xf32>
    %117 = arith.divf %116, %115 : vector<16x1xf32>
    %118 = vector.broadcast %117 : vector<16x1xf32> to vector<16x8xf32>
    %119 = arith.mulf %109, %118 : vector<16x8xf32>
    %cst_41 = arith.constant dense<0.000000e+00> : vector<8xf32>
    %120 = vector.multi_reduction <add>, %119, %cst_41 [0] : vector<16x8xf32> to vector<8xf32>
    %121 = vector.shape_cast %120 : vector<8xf32> to vector<1x8xf32>
    %cst_42 = arith.constant 8.000000e+00 : f32
    %122 = vector.broadcast %cst_42 : f32 to vector<1x8xf32>
    %123 = arith.mulf %122, %121 : vector<1x8xf32>
    %cst_43 = arith.constant 1.000000e+00 : f32
    %124 = vector.broadcast %cst_43 : f32 to vector<1x8xf32>
    %125 = arith.divf %124, %123 : vector<1x8xf32>
    %126 = vector.broadcast %117 : vector<16x1xf32> to vector<16x8xf32>
    %127 = arith.mulf %126, %109 : vector<16x8xf32>
    %128 = vector.broadcast %125 : vector<1x8xf32> to vector<16x8xf32>
    %129 = arith.mulf %127, %128 : vector<16x8xf32>
    %130 = arith.mulf %43, %129 : vector<16x8xf32>
    %131 = vector.broadcast %125 : vector<1x8xf32> to vector<16x8xf32>
    %132 = arith.mulf %130, %131 : vector<16x8xf32>
    %cst_44 = arith.constant dense<0.000000e+00> : vector<16xf32>
    %133 = vector.multi_reduction <add>, %132, %cst_44 [1] : vector<16x8xf32> to vector<16xf32>
    %134 = vector.shape_cast %133 : vector<16xf32> to vector<16x1xf32>
    %cst_45 = arith.constant 1.600000e+01 : f32
    %135 = vector.broadcast %cst_45 : f32 to vector<16x1xf32>
    %136 = arith.mulf %135, %134 : vector<16x1xf32>
    %cst_46 = arith.constant 1.000000e+00 : f32
    %137 = vector.broadcast %cst_46 : f32 to vector<16x1xf32>
    %138 = arith.divf %137, %136 : vector<16x1xf32>
    %139 = vector.broadcast %138 : vector<16x1xf32> to vector<16x8xf32>
    %140 = arith.mulf %130, %139 : vector<16x8xf32>
    %cst_47 = arith.constant dense<0.000000e+00> : vector<8xf32>
    %141 = vector.multi_reduction <add>, %140, %cst_47 [0] : vector<16x8xf32> to vector<8xf32>
    %142 = vector.shape_cast %141 : vector<8xf32> to vector<1x8xf32>
    %cst_48 = arith.constant 8.000000e+00 : f32
    %143 = vector.broadcast %cst_48 : f32 to vector<1x8xf32>
    %144 = arith.mulf %143, %142 : vector<1x8xf32>
    %cst_49 = arith.constant 1.000000e+00 : f32
    %145 = vector.broadcast %cst_49 : f32 to vector<1x8xf32>
    %146 = arith.divf %145, %144 : vector<1x8xf32>
    %147 = vector.broadcast %138 : vector<16x1xf32> to vector<16x8xf32>
    %148 = arith.mulf %147, %130 : vector<16x8xf32>
    %149 = vector.broadcast %146 : vector<1x8xf32> to vector<16x8xf32>
    %150 = arith.mulf %148, %149 : vector<16x8xf32>
    %151 = arith.mulf %40, %150 : vector<16x8xf32>
    %152 = vector.shape_cast %151 : vector<16x8xf32> to vector<1x16x8xf32>
    %cst_50 = arith.constant dense<0.000000e+00> : vector<1xf32>
    %153 = vector.multi_reduction <add>, %152, %cst_50 [1, 2] : vector<1x16x8xf32> to vector<1xf32>
    %154 = vector.shape_cast %153 : vector<1xf32> to vector<1x1x1xf32>
    %155 = vector.extract %154[0, 0, 0] : f32 from vector<1x1x1xf32>
    %156 = vector.broadcast %155 : f32 to vector<1x1xf32>
    %c0_51 = arith.constant 0 : index
    %c0_52 = arith.constant 0 : index
    %157 = vector.load %arg3[%c0_51, %c0_52] : memref<1x1xf32, #tpu.memory_space<vmem>>, vector<1x1xf32>
    tpu.vector_store %arg3[%c0_51, %c0_52], %156 {strides = array<i32>} : memref<1x1xf32, #tpu.memory_space<vmem>>, vector<1x1xf32>,
    return
  }
}

</mosaic_0001>

<bundles_post_ra>
// kernel: tpu_custom_call.1
= control target key start
LH: loop header
LB: loop body
LE: loop exit
PB: predicated region body
PF: predicated region fallthrough
CT: control target
= control target key end

     0   :  { %9 = vsyncpa [#allocation3], 0  ;;  %s763_s0 = inlined_call_operand.hbm [shape: f32[16,32], index: 0, kind: input, shape index: {}]   ;;  %s764_s1 = inlined_call_operand.hbm [shape: f32[8,32], index: 1, kind: input, shape index: {}]   ;;  %s765_s2 = inlined_call_operand.vmem [shape: f32[16,8], index: 2, kind: output, shape index: {0}]   ;;  %s766_s3 = inlined_call_operand.hbm [shape: f32[1,1], index: 3, kind: output, shape index: {1}]  }
   0x1   :  { %10 = vsyncpa [#allocation6], 0 }
   0x2   :  { %11 = vsyncpa [#allocation4], 0  ;;  %s641_s12 = smov [#allocation2]   ;;  %s569_s16 = scalar_lea.hbm %s763_s0, 256 }
   0x3   :  { %s17_s13 = sshll.u32 %s641_s12, 4  ;;  %p570_p0 = scmp.ne.s32.totalorder %s763_s0, %s569_s16  ;;  %s18_s13 = int_to_ptr.vmem [resolvable:$true] %s17_s13 }
   0x4   :  { %p573_p1 = scmp.lt.u32.totalorder %s569_s16, %s763_s0 }
   0x6   :  { %p575_p2 = pnand %p573_p1, %p570_p0 }
   0x8   :  { %578 = shalt.err (!%p575_p2)
}
   0x9   :  { %s579_s21 = scalar_lea.vmem %s18_s13, 256  ;;  %p584_p4 = scmp.lt.s32.totalorder %s18_s13, %s18_s13 }
   0xa   :  { %p580_p3 = scmp.ne.s32.totalorder %s18_s13, %s579_s21  ;;  %p585_p5 = scmp.lt.s32.totalorder %s579_s21, %s579_s21 }
   0xc   :  { %p586_p6 = por %p585_p5, %p584_p4 }
   0xe   :  { %p587_p7 = pnand %p586_p6, %p580_p3 }
  0x10   :  { %590 = shalt.err (!%p587_p7)
}
  0x11   :  { %s642_s22 = smov 128   ;;  %s643_s23 = smov 8  }
  0x12   :  { %23 = dma.hbm_to_vmem [thread:$0]  %s763_s0, 256, %s18_s13, [#allocation3], %s642_s22, %s642_s22, %s643_s23  }
  0x13   :  { %s644_s26 = smov [#allocation5]   ;;  %s591_s30 = scalar_lea.hbm %s764_s1, 128 }
  0x14   :  { %s30_s27 = sshll.u32 %s644_s26, 4  ;;  %p592_p8 = scmp.ne.s32.totalorder %s764_s1, %s591_s30  ;;  %s31_s27 = int_to_ptr.vmem [resolvable:$true] %s30_s27 }
  0x15   :  { %p595_p9 = scmp.lt.u32.totalorder %s591_s30, %s764_s1 }
  0x17   :  { %p597_p10 = pnand %p595_p9, %p592_p8 }
  0x19   :  { %600 = shalt.err (!%p597_p10)
}
  0x1a   :  { %s601_s8 = scalar_lea.vmem %s31_s27, 128  ;;  %p606_p12 = scmp.lt.s32.totalorder %s31_s27, %s31_s27 }
  0x1b   :  { %p602_p11 = scmp.ne.s32.totalorder %s31_s27, %s601_s8  ;;  %p607_p13 = scmp.lt.s32.totalorder %s601_s8, %s601_s8 }
  0x1d   :  { %p608_p0 = por %p607_p13, %p606_p12 }
  0x1f   :  { %p609_p1 = pnand %p608_p0, %p602_p11 }
  0x21   :  { %612 = shalt.err (!%p609_p1)
}
  0x22   :  { %33 = dma.hbm_to_vmem [thread:$0]  %s764_s1, 128, %s31_s27, [#allocation6]  }
  0x23   :  { %635 = dma.done.wait [#allocation3], 256  }
  0x24   :  { %636 = vsyncadd [#allocation3], 4294967040 }
  0x25   :  { %637 = dma.done.wait [#allocation6], 128  }
  0x26   :  { %638 = vsyncadd [#allocation6], 4294967168  ;;  %v645_v0 = vmov 0.0   ;;  %vm646_vm0 = vmmov 0   ;;  %v42_v1 = vld [vmem:[#allocation5] sm:$0xff]  ;;  %vm43_vm1 = vcmask 261120   ;;  %v248_v34 = vlaneseq }
  0x27   :  { %504 = vmatprep.subr.mxu1 %v645_v0  ;;  %506 = vmatprep.mubr.msk.f32.mxu1 %vm646_vm0, %v645_v0  ;;  %v40_v2 = vld [vmem:[#allocation2] sm:$0xff]  ;;  %v41_v3 = vld [vmem:[#allocation2 + $0x8] sm:$0xff]  ;;  %v159_v4 = vmul.f32 %v42_v1, %v42_v1  ;;  %v647_v9 = vmov 1.0   ;;  %vm128_vm2 = vcmask 64512   ;;  %s648_s17 = smov [#allocation7]   ;;  %vm467_vm9 = vcmask 0  }
  0x28   :  { %499 = vmatprep.subr.msk.mxu0 %vm43_vm1, %v42_v1  ;;  %501 = vmatprep.mubr.msk.f32.mxu0 %vm43_vm1, %v40_v2  ;;  %v131_v5 = vmul.f32 %v40_v2, %v40_v2  ;;  %v132_v6 = vmul.f32 %v41_v3, %v41_v3  ;;  %v249_v35 = vshrl.u32 %v248_v34, 7  ;;  %s477_s18 = sshll.u32 %s648_s17, 4  ;;  %s478_s18 = int_to_ptr.vmem [resolvable:$true] %s477_s18 }
  0x29   :  { %500 = vmatpush3.xpose.msk.msra.mxu0 %vm43_vm1, %v42_v1  ;;  %505 = vmatpush3.xpose.msk.msra.mxu1 %vm43_vm1, %v159_v4  ;;  %s613_s20 = scalar_lea.vmem %s478_s18, 16  ;;  %s617_s21 = scalar_lea.vmem %s478_s18, 32 }
  0x2a   :  { %v133_v7 = vsel %vm43_vm1, %v131_v5, 0.0  ;;  %v136_v8 = vsel %vm43_vm1, %v132_v6, 0.0  ;;  %v250_v37 = vsub.s32 0, %v249_v35  ;;  %p614_p2 = scmp.ne.s32.totalorder %s478_s18, %s613_s20  ;;  %p618_p3 = scmp.lt.s32.totalorder %s478_s18, %s478_s18 }
  0x2b   :  { %134 = vadd.xlane.f32.xlu0 %v133_v7  ;;  %p619_p4 = scmp.lt.s32.totalorder %s617_s21, %s613_s20 }
  0x2c   :  { %502 = vmatmul.mubr.msk.f32.vlgmr.msra.gmra.mrb[0].mxu0 %vm43_vm1, %v41_v3  ;;  %507 = vmatmul.mubr.msk.f32.vlgmr.msra.gmra.mrb[0].mxu1 %vm43_vm1, %v647_v9 }
  0x2d   :  { %p620_p5 = por %p619_p4, %p618_p3 }
  0x2f   :  { %137 = vadd.xlane.f32.xlu0 %v136_v8  ;;  %p621_p6 = pnand %p620_p5, %p614_p2 }
  0xb8   :  { %v135_v10 = vpop.xlane.xlu0 %134 }
  0xb9   :  { %523 = vrsqrt.f32 %v135_v10  ;;  %vm141_vm3 = vcmp.eq.f32.partialorder %v135_v10, inf  ;;  %v144_v20 = vand.u32 2147483648, %v135_v10  ;;  %vm143_vm5 = vcmp.eq.f32.partialorder %v135_v10, 0.0 }
  0xbc   :  { %v138_v11 = vpop.xlane.xlu0 %137 }
  0xbd   :  { %525 = vrsqrt.f32 %v138_v11  ;;  %vm148_vm4 = vcmp.eq.f32.partialorder %v138_v11, inf  ;;  %v151_v22 = vand.u32 2147483648, %v138_v11  ;;  %vm150_vm6 = vcmp.eq.f32.partialorder %v138_v11, 0.0 }
  0xc3   :  { %v524_v12 = vpop.eup %523 }
  0xc4   :  { %v140_v17 = vmul.f32 %v524_v12, %v135_v10 }
  0xc6   :  { %v142_v21 = vsel %vm141_vm3, %v135_v10, %v140_v17 }
  0xc7   :  { %v526_v13 = vpop.eup %525  ;;  %v145_v24 = vsel %vm143_vm5, %v144_v20, %v142_v21 }
  0xc8   :  { %v147_v19 = vmul.f32 %v526_v13, %v138_v11  ;;  %v153_v27 = vadd.f32 1e-12, %v145_v24 }
  0xca   :  { %v149_v23 = vsel %vm148_vm4, %v138_v11, %v147_v19 }
  0xcb   :  { %v152_v25 = vsel %vm150_vm6, %v151_v22, %v149_v23 }
  0xcc   :  { %v154_v29 = vadd.f32 1e-12, %v152_v25 }
  0xff   :  { %v503_v14 = vpop.f32.mrb[0].mxu0  ;;  %v232_v15 = vpop.f32.mrb[0].mxu1 }
 0x100   :  { %130 = vst.msk [vmem:[%s765_s2 + $0x8] sm:$0xff] %vm128_vm2, %v503_v14  ;;  %v119_v16 = vpop.f32.mrb[1].mxu0  ;;  %527 = vrsqrt.f32 %v232_v15  ;;  %v508_v18 = vpop.f32.mrb[1].mxu1  ;;  %vm238_vm7 = vcmp.eq.f32.partialorder %v232_v15, inf  ;;  %v241_v30 = vand.u32 2147483648, %v232_v15  ;;  %vm240_vm8 = vcmp.eq.f32.partialorder %v232_v15, 0.0 }
 0x101   :  { %129 = vst.msk [vmem:[%s765_s2] sm:$0xff] %vm128_vm2, %v119_v16  ;;  %529 = vrcp.f32 %v153_v27 }
 0x102   :  { %531 = vrcp.f32 %v154_v29 }
 0x10a   :  { %v528_v26 = vpop.eup %527 }
 0x10b   :  { %v237_v28 = vmul.f32 %v528_v26, %v232_v15  ;;  %v530_v36 = vpop.eup %529 }
 0x10c   :  { %v532_v38 = vpop.eup %531  ;;  %v246_v42 = vmul.f32 %v530_v36, %v119_v16 }
 0x10d   :  { %v239_v31 = vsel %vm238_vm7, %v232_v15, %v237_v28  ;;  %v247_v40 = vmul.f32 %v532_v38, %v503_v14 }
 0x10e   :  { %v242_v32 = vsel %vm240_vm8, %v241_v30, %v239_v31 }
 0x10f   :  { %v243_v33 = vadd.f32 1e-12, %v242_v32 }
 0x111   :  { %533 = vrcp.f32 %v243_v33 }
 0x11b   :  { %v534_v39 = vpop.eup %533 }
 0x11c   :  { %v251_v41 = vrot.slane %v534_v39, %v250_v37 }
 0x11e   :  { %v253_v43 = vmul.f32 %v251_v41, %v247_v40  ;;  %v252_v44 = vmul.f32 %v251_v41, %v246_v42 }
 0x120   :  { %v255_v45 = vsub.f32 1.0, %v253_v43  ;;  %v254_v46 = vsub.f32 1.0, %v252_v44 }
 0x122   :  { %v256_v47 = vsel %vm128_vm2, %v254_v46, inf  ;;  %v257_v48 = vsel %vm128_vm2, %v255_v45, inf  ;;  %v268_v50 = vsel %vm128_vm2, %v254_v46, -inf  ;;  %v269_v51 = vsel %vm128_vm2, %v255_v45, -inf }
 0x123   :  { %v258_v49 = vmin.f32 %v256_v47, %v257_v48  ;;  %v270_v52 = vmax.f32 %v268_v50, %v269_v51 }
 0x125   :  { %259 = vmin.xlane.f32.xlu1 %v258_v49 }
 0x129   :  { %271 = vmax.xlane.f32.xlu1 %v270_v52 }
 0x1b2   :  { %v260_v53 = vpop.xlane.xlu1 %259 }
 0x1b3   :  { %v261_v54 = vrot.slane %v260_v53, 4 }
 0x1b5   :  { %v262_v55 = vmin.f32 %v260_v53, %v261_v54 }
 0x1b6   :  { %v272_v56 = vpop.xlane.xlu1 %271 }
 0x1b7   :  { %v263_v57 = vrot.slane %v262_v55, 2  ;;  %v273_v58 = vrot.slane %v272_v56, 4 }
 0x1b9   :  { %v274_v59 = vmax.f32 %v272_v56, %v273_v58  ;;  %v264_v60 = vmin.f32 %v262_v55, %v263_v57 }
 0x1bb   :  { %v275_v61 = vrot.slane %v274_v59, 2  ;;  %v265_v62 = vrot.slane %v264_v60, 1 }
 0x1bd   :  { %v266_v63 = vmin.f32 %v264_v60, %v265_v62  ;;  %v276_v0 = vmax.f32 %v274_v59, %v275_v61 }
 0x1bf   :  { %509 = vpush %v266_v63  ;;  %v277_v1 = vrot.slane %v276_v0, 1 }
 0x1c1   :  { %v278_v2 = vmax.f32 %v276_v0, %v277_v1 }
 0x1c3   :  { %511 = vpush %v278_v2 }
 0x1f0   :  { %s510_s2 = spop %509 }
 0x1f4   :  { %s512_s13 = spop %511 }
 0x1f5   :  { %s280_s14 = ssub.f32 %s512_s13, %s510_s2 }
 0x1f7   :  { %s281_s15 = smul.f32 0.1, %s280_s14 }
 0x1f9   :  { %s282_s16 = sadd.f32 %s510_s2, %s281_s15 }
 0x1fb   :  { %v283_v3 = vstv %s282_s16 }
 0x1fc   :  { %v284_v4 = vsub.f32 %v254_v46, %v283_v3  ;;  %v285_v5 = vsub.f32 %v255_v45, %v283_v3 }
 0x1fe   :  { %v705_v6 = vmax.f32 %v284_v4, 0.0  ;;  %v707_v7 = vmax.f32 %v285_v5, 0.0 }
 0x200   :  { %v288_v8 = vmul.f32 -2.0, %v705_v6  ;;  %v289_v9 = vmul.f32 -2.0, %v707_v7 }
 0x202   :  { %v290_v10 = vmul.f32 1.442695, %v288_v8  ;;  %v292_v11 = vmul.f32 1.442695, %v289_v9 }
 0x204   :  { %535 = vpow2.f32 %v290_v10 }
 0x205   :  { %537 = vpow2.f32 %v292_v11 }
 0x20e   :  { %v711_v12 = vpop.eup %535 }
 0x20f   :  { %v713_v13 = vpop.eup %537  ;;  %v294_v14 = vmul.f32 0.125, %v711_v12 }
 0x210   :  { %v295_v15 = vmul.f32 0.125, %v713_v13 }
 0x211   :  { %v296_v16 = vsel %vm128_vm2, %v294_v14, 0.0 }
 0x212   :  { %v299_v17 = vsel %vm128_vm2, %v295_v15, 0.0  ;;  %297 = vadd.xlane.f32.xlu0 %v296_v16 }
 0x213   :  { %300 = vadd.xlane.f32.xlu1 %v299_v17 }
 0x29f   :  { %v298_v18 = vpop.xlane.xlu0 %297 }
 0x2a0   :  { %v301_v19 = vpop.xlane.xlu1 %300  ;;  %v302_v20 = vmul.f32 16.0, %v298_v18 }
 0x2a1   :  { %v303_v21 = vmul.f32 16.0, %v301_v19 }
 0x2a2   :  { %539 = vrcp.f32 %v302_v20 }
 0x2a3   :  { %541 = vrcp.f32 %v303_v21 }
 0x2ac   :  { %v540_v22 = vpop.eup %539 }
 0x2ad   :  { %v542_v23 = vpop.eup %541  ;;  %v308_v24 = vmul.f32 %v540_v22, %v711_v12 }
 0x2ae   :  { %v309_v25 = vmul.f32 %v542_v23, %v713_v13 }
 0x2af   :  { %v310_v26 = vsel %vm128_vm2, %v308_v24, 0.0 }
 0x2b0   :  { %v311_v27 = vsel %vm128_vm2, %v309_v25, 0.0 }
 0x2b1   :  { %v312_v28 = vadd.f32 %v311_v27, %v310_v26 }
 0x2b3   :  { %v313_v29 = vrot.slane %v312_v28, 4 }
 0x2b5   :  { %v314_v30 = vadd.f32 %v313_v29, %v312_v28 }
 0x2b7   :  { %v315_v31 = vrot.slane %v314_v30, 2 }
 0x2b9   :  { %v316_v32 = vadd.f32 %v315_v31, %v314_v30 }
 0x2bb   :  { %v317_v33 = vrot.slane %v316_v32, 1 }
 0x2bd   :  { %v318_v34 = vadd.f32 %v317_v33, %v316_v32 }
 0x2bf   :  { %v319_v35 = vmul.f32 8.0, %v318_v34 }
 0x2c1   :  { %543 = vrcp.f32 %v319_v35 }
 0x2cb   :  { %v544_v36 = vpop.eup %543 }
 0x2cc   :  { %v323_v37 = vmul.f32 %v544_v36, %v309_v25  ;;  %v322_v38 = vmul.f32 %v544_v36, %v308_v24 }
 0x2ce   :  { %v325_v39 = vmul.f32 %v713_v13, %v323_v37  ;;  %v324_v40 = vmul.f32 %v711_v12, %v322_v38 }
 0x2d0   :  { %v327_v41 = vmul.f32 %v544_v36, %v325_v39  ;;  %v326_v42 = vmul.f32 %v544_v36, %v324_v40 }
 0x2d2   :  { %v331_v43 = vsel %vm128_vm2, %v327_v41, 0.0  ;;  %v328_v44 = vsel %vm128_vm2, %v326_v42, 0.0 }
 0x2d3   :  { %332 = vadd.xlane.f32.xlu1 %v331_v43  ;;  %329 = vadd.xlane.f32.xlu0 %v328_v44 }
 0x360   :  { %v333_v45 = vpop.xlane.xlu1 %332  ;;  %v330_v46 = vpop.xlane.xlu0 %329 }
 0x361   :  { %v335_v47 = vmul.f32 16.0, %v333_v45  ;;  %v334_v48 = vmul.f32 16.0, %v330_v46 }
 0x363   :  { %545 = vrcp.f32 %v335_v47 }
 0x364   :  { %547 = vrcp.f32 %v334_v48 }
 0x36d   :  { %v546_v49 = vpop.eup %545 }
 0x36e   :  { %v548_v50 = vpop.eup %547  ;;  %v341_v51 = vmul.f32 %v546_v49, %v325_v39 }
 0x36f   :  { %v340_v52 = vmul.f32 %v548_v50, %v324_v40 }
 0x370   :  { %v343_v53 = vsel %vm128_vm2, %v341_v51, 0.0 }
 0x371   :  { %v342_v54 = vsel %vm128_vm2, %v340_v52, 0.0 }
 0x372   :  { %v344_v55 = vadd.f32 %v343_v53, %v342_v54 }
 0x374   :  { %v345_v56 = vrot.slane %v344_v55, 4 }
 0x376   :  { %v346_v57 = vadd.f32 %v345_v56, %v344_v55 }
 0x378   :  { %v347_v58 = vrot.slane %v346_v57, 2 }
 0x37a   :  { %v348_v59 = vadd.f32 %v347_v58, %v346_v57 }
 0x37c   :  { %v349_v60 = vrot.slane %v348_v59, 1 }
 0x37e   :  { %v350_v61 = vadd.f32 %v349_v60, %v348_v59 }
 0x380   :  { %v351_v62 = vmul.f32 8.0, %v350_v61 }
 0x382   :  { %549 = vrcp.f32 %v351_v62 }
 0x38c   :  { %v550_v63 = vpop.eup %549 }
 0x38d   :  { %v355_v0 = vmul.f32 %v550_v63, %v341_v51  ;;  %v354_v1 = vmul.f32 %v550_v63, %v340_v52 }
 0x38f   :  { %v357_v2 = vmul.f32 %v713_v13, %v355_v0  ;;  %v356_v3 = vmul.f32 %v711_v12, %v354_v1 }
 0x391   :  { %v359_v4 = vmul.f32 %v550_v63, %v357_v2  ;;  %v358_v5 = vmul.f32 %v550_v63, %v356_v3 }
 0x393   :  { %v363_v8 = vsel %vm128_vm2, %v359_v4, 0.0  ;;  %v360_v9 = vsel %vm128_vm2, %v358_v5, 0.0 }
 0x394   :  { %364 = vadd.xlane.f32.xlu1 %v363_v8  ;;  %361 = vadd.xlane.f32.xlu0 %v360_v9 }
 0x421   :  { %v365_v10 = vpop.xlane.xlu1 %364  ;;  %v362_v11 = vpop.xlane.xlu0 %361 }
 0x422   :  { %v367_v14 = vmul.f32 16.0, %v365_v10  ;;  %v366_v15 = vmul.f32 16.0, %v362_v11 }
 0x424   :  { %551 = vrcp.f32 %v367_v14 }
 0x425   :  { %553 = vrcp.f32 %v366_v15 }
 0x42e   :  { %v552_v16 = vpop.eup %551 }
 0x42f   :  { %v554_v17 = vpop.eup %553  ;;  %v373_v18 = vmul.f32 %v552_v16, %v357_v2 }
 0x430   :  { %v372_v19 = vmul.f32 %v554_v17, %v356_v3 }
 0x431   :  { %v375_v20 = vsel %vm128_vm2, %v373_v18, 0.0 }
 0x432   :  { %v374_v21 = vsel %vm128_vm2, %v372_v19, 0.0 }
 0x433   :  { %v376_v22 = vadd.f32 %v375_v20, %v374_v21 }
 0x435   :  { %v377_v23 = vrot.slane %v376_v22, 4 }
 0x437   :  { %v378_v24 = vadd.f32 %v377_v23, %v376_v22 }
 0x439   :  { %v379_v25 = vrot.slane %v378_v24, 2 }
 0x43b   :  { %v380_v26 = vadd.f32 %v379_v25, %v378_v24 }
 0x43d   :  { %v381_v27 = vrot.slane %v380_v26, 1 }
 0x43f   :  { %v382_v28 = vadd.f32 %v381_v27, %v380_v26 }
 0x441   :  { %v383_v29 = vmul.f32 8.0, %v382_v28 }
 0x443   :  { %555 = vrcp.f32 %v383_v29 }
 0x44d   :  { %v556_v30 = vpop.eup %555 }
 0x44e   :  { %v387_v31 = vmul.f32 %v556_v30, %v373_v18  ;;  %v386_v32 = vmul.f32 %v556_v30, %v372_v19 }
 0x450   :  { %v389_v33 = vmul.f32 %v713_v13, %v387_v31  ;;  %v388_v34 = vmul.f32 %v711_v12, %v386_v32 }
 0x452   :  { %v391_v35 = vmul.f32 %v556_v30, %v389_v33  ;;  %v390_v36 = vmul.f32 %v556_v30, %v388_v34 }
 0x454   :  { %v395_v37 = vsel %vm128_vm2, %v391_v35, 0.0  ;;  %v392_v38 = vsel %vm128_vm2, %v390_v36, 0.0 }
 0x455   :  { %396 = vadd.xlane.f32.xlu1 %v395_v37  ;;  %393 = vadd.xlane.f32.xlu0 %v392_v38 }
 0x4e2   :  { %v397_v39 = vpop.xlane.xlu1 %396  ;;  %v394_v40 = vpop.xlane.xlu0 %393 }
 0x4e3   :  { %v399_v41 = vmul.f32 16.0, %v397_v39  ;;  %v398_v42 = vmul.f32 16.0, %v394_v40 }
 0x4e5   :  { %557 = vrcp.f32 %v399_v41 }
 0x4e6   :  { %559 = vrcp.f32 %v398_v42 }
 0x4ef   :  { %v558_v43 = vpop.eup %557 }
 0x4f0   :  { %v560_v44 = vpop.eup %559  ;;  %v405_v45 = vmul.f32 %v558_v43, %v389_v33 }
 0x4f1   :  { %v404_v46 = vmul.f32 %v560_v44, %v388_v34 }
 0x4f2   :  { %v407_v47 = vsel %vm128_vm2, %v405_v45, 0.0 }
 0x4f3   :  { %v406_v48 = vsel %vm128_vm2, %v404_v46, 0.0 }
 0x4f4   :  { %v408_v49 = vadd.f32 %v407_v47, %v406_v48 }
 0x4f6   :  { %v409_v50 = vrot.slane %v408_v49, 4 }
 0x4f8   :  { %v410_v51 = vadd.f32 %v409_v50, %v408_v49 }
 0x4fa   :  { %v411_v52 = vrot.slane %v410_v51, 2 }
 0x4fc   :  { %v412_v53 = vadd.f32 %v411_v52, %v410_v51 }
 0x4fe   :  { %v413_v54 = vrot.slane %v412_v53, 1 }
 0x500   :  { %v414_v55 = vadd.f32 %v413_v54, %v412_v53 }
 0x502   :  { %v415_v56 = vmul.f32 8.0, %v414_v55 }
 0x504   :  { %561 = vrcp.f32 %v415_v56 }
 0x50e   :  { %v562_v57 = vpop.eup %561 }
 0x50f   :  { %v419_v58 = vmul.f32 %v562_v57, %v405_v45  ;;  %v418_v59 = vmul.f32 %v562_v57, %v404_v46 }
 0x511   :  { %v421_v60 = vmul.f32 %v713_v13, %v419_v58  ;;  %v420_v61 = vmul.f32 %v711_v12, %v418_v59 }
 0x513   :  { %v423_v62 = vmul.f32 %v562_v57, %v421_v60  ;;  %v422_v63 = vmul.f32 %v562_v57, %v420_v61 }
 0x515   :  { %v427_v0 = vsel %vm128_vm2, %v423_v62, 0.0  ;;  %v424_v1 = vsel %vm128_vm2, %v422_v63, 0.0 }
 0x516   :  { %428 = vadd.xlane.f32.xlu1 %v427_v0  ;;  %425 = vadd.xlane.f32.xlu0 %v424_v1 }
 0x5a3   :  { %v429_v2 = vpop.xlane.xlu1 %428  ;;  %v426_v3 = vpop.xlane.xlu0 %425 }
 0x5a4   :  { %v431_v4 = vmul.f32 16.0, %v429_v2  ;;  %v430_v5 = vmul.f32 16.0, %v426_v3 }
 0x5a6   :  { %563 = vrcp.f32 %v431_v4 }
 0x5a7   :  { %565 = vrcp.f32 %v430_v5 }
 0x5b0   :  { %v564_v8 = vpop.eup %563 }
 0x5b1   :  { %v566_v9 = vpop.eup %565  ;;  %v437_v10 = vmul.f32 %v564_v8, %v421_v60 }
 0x5b2   :  { %v436_v13 = vmul.f32 %v566_v9, %v420_v61 }
 0x5b3   :  { %v439_v12 = vsel %vm128_vm2, %v437_v10, 0.0 }
 0x5b4   :  { %v438_v11 = vsel %vm128_vm2, %v436_v13, 0.0 }
 0x5b5   :  { %v440_v14 = vadd.f32 %v439_v12, %v438_v11 }
 0x5b7   :  { %v441_v15 = vrot.slane %v440_v14, 4 }
 0x5b9   :  { %v442_v16 = vadd.f32 %v441_v15, %v440_v14 }
 0x5bb   :  { %v443_v17 = vrot.slane %v442_v16, 2 }
 0x5bd   :  { %v444_v18 = vadd.f32 %v443_v17, %v442_v16 }
 0x5bf   :  { %v445_v19 = vrot.slane %v444_v18, 1 }
 0x5c1   :  { %v446_v20 = vadd.f32 %v445_v19, %v444_v18 }
 0x5c3   :  { %v447_v21 = vmul.f32 8.0, %v446_v20 }
 0x5c5   :  { %567 = vrcp.f32 %v447_v21 }
 0x5cf   :  { %v568_v22 = vpop.eup %567 }
 0x5d0   :  { %v450_v23 = vmul.f32 %v568_v22, %v436_v13  ;;  %v451_v24 = vmul.f32 %v568_v22, %v437_v10 }
 0x5d2   :  { %v452_v25 = vmul.f32 %v450_v23, %v705_v6  ;;  %v453_v26 = vmul.f32 %v451_v24, %v707_v7 }
 0x5d4   :  { %v454_v27 = vsel %vm128_vm2, %v452_v25, 0.0  ;;  %v455_v28 = vsel %vm128_vm2, %v453_v26, 0.0 }
 0x5d5   :  { %v456_v29 = vadd.f32 %v455_v28, %v454_v27 }
 0x5d7   :  { %457 = vadd.xlane.f32.xlu0 %v456_v29 }
 0x664   :  { %v458_v30 = vpop.xlane.xlu0 %457 }
 0x665   :  { %v459_v31 = vrot.slane %v458_v30, 4 }
 0x667   :  { %v460_v32 = vadd.f32 %v459_v31, %v458_v30 }
 0x669   :  { %v461_v33 = vrot.slane %v460_v32, 2 }
 0x66b   :  { %v462_v34 = vadd.f32 %v461_v33, %v460_v32 }
 0x66d   :  { %v463_v35 = vrot.slane %v462_v34, 1 }
 0x66f   :  { %v464_v36 = vadd.f32 %v463_v35, %v462_v34 }
 0x671   :  { %513 = vpush %v464_v36 }
 0x6a2   :  { %s514_s19 = spop %513 }
 0x6a3   :  { %v466_v6 = vstv %s514_s19 }
 0x6a4   :  { %468 = vst.msk [vmem:[#allocation7] sm:$0x1] %vm467_vm9, %v466_v6 }
 0x6a5   :  { %624 = shalt.err (!%p621_p6)
}
 0x6a6   :  { %s625_s24 = scalar_lea.hbm %s766_s3, 16 }
 0x6a7   :  { %p626_p7 = scmp.ne.s32.totalorder %s766_s3, %s625_s24  ;;  %p629_p8 = scmp.lt.u32.totalorder %s625_s24, %s766_s3 }
 0x6a9   :  { %p631_p9 = pnand %p629_p8, %p626_p7 }
 0x6ab   :  { %634 = shalt.err (!%p631_p9)
}
 0x6ac   :  { %480 = dma.vmem_to_hbm [thread:$0]  %s478_s18, 16, %s766_s3, [#allocation4]  }
 0x6ad   :  { %639 = dma.done.wait [#allocation4], 16  }
 0x6ae   :  { %640 = vsyncadd [#allocation4], 4294967280 }
 0x6af   :  { %486 = vsyncpa [#allocation3], 1 }
 0x6b0   :  { %487 = vsyncpa [#allocation6], 1 }
 0x6b1   :  { %488 = vsyncpa [#allocation4], 1 }

</bundles_post_ra>
